<compile_context>
chip_gen: v5e
topology: v5e:2x2
jax: 0.10.0
libtpu: 0.0.40
codegen_flags: <defaults>
</compile_context>

<pallas_src>
import math

import jax
import jax.numpy as jnp
import numpy as np
from jax.experimental import pallas as pl
from jax.experimental.pallas import tpu as pltpu


def _make_genconv_kernel(*, temperature, K, D, has_mask, mask_is_3d, mm_dtype):
    inv_t = 1.0 / float(temperature)
    bf16 = jnp.dtype(jnp.bfloat16)

    def kernel(*refs):
        if has_mask:
            (score_ref, x_ref, mask_ref, wx_ref, bx_ref, wy_ref, by_ref,
             out_ref, xbar_scr) = refs
        else:
            (score_ref, x_ref, wx_ref, bx_ref, wy_ref, by_ref,
             out_ref, xbar_scr) = refs
            mask_ref = None

        # ---- xbar = Wx_stacked @ x_b^T + bx : (KD, M); computed ONCE per batch
        #      (j is the innermost "arbitrary" axis; scratch persists across j) ----
        @pl.when(pl.program_id(1) == 0)
        def _():
            xb = jax.lax.dot_general(wx_ref[...], x_ref[0],
                                     (((1,), (0,)), ((), ())),
                                     preferred_element_type=jnp.float32)   # (KD, M)
            xb = xb + bx_ref[...]                                          # (KD,1) bcast
            xbar_scr[...] = xb.reshape(K, D, xb.shape[-1]).astype(xbar_scr.dtype)

        # ---- unnormalized softmax numerator over M (dim=-2), all heads at once ----
        s = score_ref[0].astype(jnp.float32)                    # (K, M, TN) f32
        if has_mask:
            m = mask_ref[0] if mask_is_3d else mask_ref[...]    # (M, TN)
            s = s + m.astype(jnp.float32)[None, :, :]
        if inv_t != 1.0:                                        # temperature==1 fast path
            s = s * inv_t
        s = s - jnp.max(s, axis=1, keepdims=True)
        if mm_dtype == bf16:
            # bf16 exp: 2x EUP throughput on v6e/v7x (upcast path on v5e is still
            # correct); row-sum accumulated in f32.
            p = jnp.exp(s.astype(jnp.bfloat16))                 # (K, M, TN) bf16
            denom = jnp.sum(p.astype(jnp.float32), axis=1, keepdims=True)
        else:
            p = jnp.exp(s)                                      # f32 exact path
            denom = jnp.sum(p, axis=1, keepdims=True)
        p_mm = p if p.dtype == mm_dtype else p.astype(mm_dtype)
        recip = pl.reciprocal(denom, approx=True)               # (K, 1, TN) f32

        # ---- per-head contraction over M, N on the lane axis; normalization is
        #      deferred to the small (D, TN) result instead of the (K, M, TN) attn ----
        parts = []
        for k in range(K):
            xb_k = xbar_scr[k]                                  # (D, M) mm_dtype
            r_k = jax.lax.dot_general(xb_k, p_mm[k], (((1,), (0,)), ((), ())),
                                      preferred_element_type=jnp.float32)  # (D, TN)
            parts.append(r_k * recip[k])                        # per-(k, n) scale
        r = jnp.concatenate(parts, axis=0).astype(mm_dtype)     # (KD, TN)

        # ---- stacked output projection, lane-dense along N: (Q, KD) @ (KD, TN) ----
        y = jax.lax.dot_general(wy_ref[...], r, (((1,), (0,)), ((), ())),
                                preferred_element_type=jnp.float32)        # (Q, TN)
        out_ref[0] = (y + by_ref[...]).astype(out_ref.dtype)

    return kernel


def _vmem_budget_bytes():
    try:
        cap = int(pltpu.get_tpu_info().vmem_capacity_bytes)
    except Exception:
        cap = 64 * 1024 * 1024          # conservative fallback (v7x per-core VMEM)
    return (cap * 3) // 4               # ~48 MiB on v7x, ~96 MiB on v5e/v6e


def _pick_tile_n(N, *, K, M, P, Q, KD, score_bytes, mm_bytes, has_mask,
                 budget, block_n):
    if block_n is not None:
        return max(1, min(int(block_n), N))
    if N <= 256:
        return N
    # VMEM cost model (bytes) as a function of tn:
    #   score tile (double-buffered)   : 2*K*M*tn*score_bytes
    #   mask tile                      : 2*M*tn*4            (if present)
    #   softmax working set (s, p, ..) : ~K*M*tn*8
    #   output tile (double-buffered)  : 2*Q*tn*4
    # plus tn-independent terms (x tile, xbar scratch, stacked weights).
    fixed = (2 * P * M * mm_bytes + KD * M * mm_bytes
             + 2 * (KD * P + Q * KD) * mm_bytes + 4 * (KD + Q))
    per_tn = 2 * K * M * score_bytes + K * M * 8 + 2 * Q * 4
    if has_mask:
        per_tn += 2 * M * 4
    max_tn = min(2048, ((N + 127) // 128) * 128)
    tn, cand = 128, 128
    while cand <= max_tn and fixed + per_tn * cand <= budget:
        tn = cand
        cand += 128
    return tn


def generalised_convolution(score, x, wx, bx, wy, by, mask=None, temperature=1.0,
                            matmul_dtype=jnp.bfloat16, score_dtype=jnp.bfloat16,
                            block_n=None):
    """Fused GeneralisedConvolution forward.  Returns y : (B, N, Q) in f32.

    matmul_dtype: MXU-operand dtype (default bf16 fast path; pass jnp.float32 for exact).
    score_dtype:  dtype of the score HBM stream (default bf16; pass jnp.float32 for exact).
    """
    B, K, M, N = score.shape
    Bx, Mx, P = x.shape
    Kx, Px, D = wx.shape
    Ky, Q, Dy = wy.shape
    assert (Bx, Mx) == (B, M) and (Kx, Px) == (K, P) and (Ky, Dy) == (K, D)
    assert bx.shape == (K, D) and by.shape == (Q,)
    KD = K * D

    mm_dtype = jnp.dtype(matmul_dtype)
    s_dtype = jnp.dtype(score_dtype)

    # Stack per-head projections: ONE xbar matmul and ONE output projection.
    # Column/row ordering is k*D + d for both.
    wx_s = wx.transpose(0, 2, 1).reshape(KD, P).astype(mm_dtype)   # (KD, P)
    wy_s = wy.transpose(1, 0, 2).reshape(Q, KD).astype(mm_dtype)   # (Q, KD)
    bx_s = bx.reshape(KD, 1).astype(jnp.float32)
    by_s = by.reshape(Q, 1).astype(jnp.float32)
    x_t = jnp.swapaxes(x, 1, 2).astype(mm_dtype)                   # (B, P, M)
    score_c = score.astype(s_dtype)

    has_mask = mask is not None
    mask_is_3d = bool(has_mask and mask.ndim == 3)

    budget = _vmem_budget_bytes()
    tn = _pick_tile_n(N, K=K, M=M, P=P, Q=Q, KD=KD,
                      score_bytes=s_dtype.itemsize, mm_bytes=mm_dtype.itemsize,
                      has_mask=has_mask, budget=budget, block_n=block_n)
    n_tiles = pl.cdiv(N, tn)

    in_specs = [
        pl.BlockSpec((1, K, M, tn), lambda b, j: (b, 0, 0, j)),    # score
        pl.BlockSpec((1, P, M),     lambda b, j: (b, 0, 0)),       # x^T (reused across j)
    ]
    args = [score_c, x_t]
    if has_mask:
        if mask_is_3d:
            in_specs.append(pl.BlockSpec((1, M, tn), lambda b, j: (b, 0, j)))
        else:
            in_specs.append(pl.BlockSpec((M, tn), lambda b, j: (0, j)))
        args.append(mask.astype(jnp.float32))
    in_specs += [
        pl.BlockSpec((KD, P), lambda b, j: (0, 0)),                # Wx stacked
        pl.BlockSpec((KD, 1), lambda b, j: (0, 0)),                # bx stacked
        pl.BlockSpec((Q, KD), lambda b, j: (0, 0)),                # Wy stacked
        pl.BlockSpec((Q, 1),  lambda b, j: (0, 0)),                # by
    ]
    args += [wx_s, bx_s, wy_s, by_s]

    kernel = _make_genconv_kernel(temperature=float(temperature), K=K, D=D,
                                  has_mask=has_mask, mask_is_3d=mask_is_3d,
                                  mm_dtype=mm_dtype)

    flops = 2 * B * (K * M * N * D + KD * P * M + Q * KD * N)
    bytes_accessed = (B * K * M * N * s_dtype.itemsize                    # score
                      + B * M * P * mm_dtype.itemsize                     # x
                      + ((B if mask_is_3d else 1) * M * N * 4 if has_mask else 0)
                      + B * N * Q * 4                                     # out
                      + (KD * P + Q * KD) * mm_dtype.itemsize + (KD + Q) * 4)
    cost = pl.CostEstimate(flops=int(flops), transcendentals=int(B * K * M * N),
                           bytes_accessed=int(bytes_accessed))

    y_qn = pl.pallas_call(
        kernel,
        out_shape=jax.ShapeDtypeStruct((B, Q, N), jnp.float32),
        grid=(B, n_tiles),
        in_specs=in_specs,
        out_specs=pl.BlockSpec((1, Q, tn), lambda b, j: (b, 0, j)),
        scratch_shapes=[pltpu.VMEM((K, D, M), mm_dtype)],                 # xbar, per batch
        compiler_params=pltpu.CompilerParams(
            dimension_semantics=("parallel", "arbitrary"),
            vmem_limit_bytes=int(budget)),
        cost_estimate=cost,
    )(*args)
    return jnp.swapaxes(y_qn, 1, 2)                                       # (B, N, Q)


def _xavier_uniform(key, shape):
    # torch.nn.init.xavier_uniform_ fan computation for a 3-D tensor (d0, d1, d2):
    # fan_in = d1 * d2, fan_out = d0 * d2
    fan_in = shape[1] * shape[2]
    fan_out = shape[0] * shape[2]
    bound = math.sqrt(6.0 / (fan_in + fan_out))
    return jax.random.uniform(key, shape, jnp.float32, minval=-bound, maxval=bound)


def _reference(score, x, wx, bx, wy, by, mask, temperature):
    r = score
    if mask is not None:
        r = r + (mask[None, None] if mask.ndim == 2 else mask[:, None])
    r = jax.nn.softmax(r / temperature, axis=-2)
    xbar = jnp.einsum('kpd,bmp->bkmd', wx, x) + bx[None, :, None, :]
    r = jnp.einsum('bkmn,bkmd->bknd', r, xbar)
    return jnp.einsum('kqd,bknd->bnq', wy, r) + by[None, None, :]


if __name__ == "__main__":
    # GeneralisedConvolution(K=4, P=32, Q=32) -> D = Q // K = 8
    B, K, M, N = 2, 4, 16, 16
    P, Q = 32, 32
    D = Q // K
    temperature = 1.0

    key = jax.random.PRNGKey(0)
    k_score, k_x, k_mask, k_wx, k_wy, k_bx, k_by, k_big = jax.random.split(key, 8)

    score = jax.random.normal(k_score, (B, K, M, N), jnp.float32)
    x = jax.random.normal(k_x, (B, M, P), jnp.float32)
    mask2d = jax.random.normal(k_mask, (M, N), jnp.float32)    # log-domain additive mask
    mask3d = jnp.broadcast_to(mask2d[None], (B, M, N)) * 0.5

    wx = _xavier_uniform(k_wx, (K, P, D))                      # projx weight 'kpd'
    bx = 0.1 * jax.random.normal(k_bx, (K, D), jnp.float32)    # projx bias (1,K,1,D) collapsed
    wy = _xavier_uniform(k_wy, (K, Q, D))                      # projy weight 'kqd'
    by = 0.1 * jax.random.normal(k_by, (Q,), jnp.float32)      # projy bias (1,1,Q) collapsed

    # 1) exact path (f32 score + f32 MXU operands), 2-D mask
    y1 = generalised_convolution(score, x, wx, bx, wy, by, mask=mask2d,
                                 temperature=temperature,
                                 matmul_dtype=jnp.float32, score_dtype=jnp.float32)
    y1 = jax.block_until_ready(y1)
    np.testing.assert_allclose(np.asarray(y1),
                               np.asarray(_reference(score, x, wx, bx, wy, by, mask2d, temperature)),
                               atol=2e-3, rtol=2e-3)

    # 2) default fast path (bf16 score + bf16 MXU + bf16 exp), no mask
    y2 = generalised_convolution(score, x, wx, bx, wy, by, mask=None,
                                 temperature=temperature)
    y2 = jax.block_until_ready(y2)
    np.testing.assert_allclose(np.asarray(y2),
                               np.asarray(_reference(score, x, wx, bx, wy, by, None, temperature)),
                               atol=2e-2, rtol=5e-2)

    # 3) default fast path, 3-D per-batch mask
    y3 = generalised_convolution(score, x, wx, bx, wy, by, mask=mask3d,
                                 temperature=temperature)
    y3 = jax.block_until_ready(y3)
    np.testing.assert_allclose(np.asarray(y3),
                               np.asarray(_reference(score, x, wx, bx, wy, by, mask3d, temperature)),
                               atol=2e-2, rtol=5e-2)

    # 4) multi N-tile case: exercises the per-batch xbar hoist (pl.when(j==0)) and
    #    scratch reuse across the "arbitrary" j axis.
    M4, N4 = 32, 384
    ks, kx4, km4 = jax.random.split(k_big, 3)
    score4 = jax.random.normal(ks, (B, K, M4, N4), jnp.float32)
    x4 = jax.random.normal(kx4, (B, M4, P), jnp.float32)
    mask4 = jax.random.normal(km4, (M4, N4), jnp.float32)
    y4 = generalised_convolution(score4, x4, wx, bx, wy, by, mask=mask4,
                                 temperature=0.7, block_n=128,
                                 matmul_dtype=jnp.float32, score_dtype=jnp.float32)
    y4 = jax.block_until_ready(y4)
    np.testing.assert_allclose(np.asarray(y4),
                               np.asarray(_reference(score4, x4, wx, bx, wy, by, mask4, 0.7)),
                               atol=2e-3, rtol=2e-3)

    # 5) partial last N-tile (N % tn != 0): padded score columns stay confined to
    #    dropped output columns (contraction is per-column).
    N5 = 200
    score5 = score4[..., :N5]
    y5 = generalised_convolution(score5, x4, wx, bx, wy, by, mask=None,
                                 temperature=temperature, block_n=128,
                                 matmul_dtype=jnp.float32, score_dtype=jnp.float32)
    y5 = jax.block_until_ready(y5)
    np.testing.assert_allclose(np.asarray(y5),
                               np.asarray(_reference(score5, x4, wx, bx, wy, by, None, temperature)),
                               atol=2e-3, rtol=2e-3)

    print("KERNEL_OK")
</pallas_src>

<mosaic_0001>
module attributes {stable_mosaic.version = 11 : i64} {
  func.func @kernel(%arg0: i32, %arg1: i32, %arg2: memref<1x4x16x16xf32, #tpu.memory_space<vmem>>, %arg3: memref<1x32x16xf32, #tpu.memory_space<vmem>>, %arg4: memref<16x16xf32, #tpu.memory_space<vmem>>, %arg5: memref<32x32xf32, #tpu.memory_space<vmem>>, %arg6: memref<32x1xf32, #tpu.memory_space<vmem>>, %arg7: memref<32x32xf32, #tpu.memory_space<vmem>>, %arg8: memref<32x1xf32, #tpu.memory_space<vmem>>, %arg9: memref<1x32x16xf32, #tpu.memory_space<vmem>>, %arg10: memref<4x8x16xf32, #tpu.memory_space<vmem>>) attributes {dimension_semantics = [#tpu.dimension_semantics<parallel>, #tpu.dimension_semantics<arbitrary>], iteration_bounds = array<i64: 2, 1>, scalar_prefetch = 0 : i64, scratch_operands = 1 : i64, tpu.core_type = #tpu.core_type<tc>, window_params = [{transform_indices = @transform_0, window_bounds = array<i64: 1, 4, 16, 16>}, {transform_indices = @transform_1, window_bounds = array<i64: 1, 32, 16>}, {transform_indices = @transform_2, window_bounds = array<i64: 16, 16>}, {pipeline_mode = #tpu.pipeline_mode<synchronous>, transform_indices = @transform_3, window_bounds = array<i64: 32, 32>}, {pipeline_mode = #tpu.pipeline_mode<synchronous>, transform_indices = @transform_4, window_bounds = array<i64: 32, 1>}, {pipeline_mode = #tpu.pipeline_mode<synchronous>, transform_indices = @transform_5, window_bounds = array<i64: 32, 32>}, {pipeline_mode = #tpu.pipeline_mode<synchronous>, transform_indices = @transform_6, window_bounds = array<i64: 32, 1>}, {transform_indices = @transform_7, window_bounds = array<i64: 1, 32, 16>}]} {
    %c0_i32 = arith.constant 0 : i32
    %0 = arith.cmpi eq, %arg1, %c0_i32 : i32
    %1 = arith.extui %0 : i1 to i32
    %c0_i32_0 = arith.constant 0 : i32
    %2 = arith.cmpi ne, %1, %c0_i32_0 : i32
    scf.if %2 {
      %c0_28 = arith.constant 0 : index
      %c0_29 = arith.constant 0 : index
      %62 = vector.load %arg5[%c0_28, %c0_29] : memref<32x32xf32, #tpu.memory_space<vmem>>, vector<32x32xf32>
      %c0_30 = arith.constant 0 : index
      %c0_31 = arith.constant 0 : index
      %c0_32 = arith.constant 0 : index
      %63 = vector.load %arg3[%c0_30, %c0_31, %c0_32] : memref<1x32x16xf32, #tpu.memory_space<vmem>>, vector<1x32x16xf32>
      %64 = vector.shape_cast %63 : vector<1x32x16xf32> to vector<32x16xf32>
      %cst_33 = arith.constant dense<0.000000e+00> : vector<32x16xf32>
      %65 = tpu.matmul %62, %64, %cst_33 {dimension_numbers = #tpu.dot_dimension_numbers<[1], [0], [0], [1], [0, 0, 1, 1], [], []>} : vector<32x32xf32>, vector<32x16xf32>, vector<32x16xf32> -> vector<32x16xf32>
      %c0_34 = arith.constant 0 : index
      %c0_35 = arith.constant 0 : index
      %66 = vector.load %arg6[%c0_34, %c0_35] : memref<32x1xf32, #tpu.memory_space<vmem>>, vector<32x1xf32>
      %67 = vector.broadcast %66 : vector<32x1xf32> to vector<32x16xf32>
      %68 = arith.addf %65, %67 : vector<32x16xf32>
      %69 = vector.shape_cast %68 : vector<32x16xf32> to vector<4x8x16xf32>
      %c0_36 = arith.constant 0 : index
      %c0_37 = arith.constant 0 : index
      %c0_38 = arith.constant 0 : index
      %70 = vector.load %arg10[%c0_36, %c0_37, %c0_38] : memref<4x8x16xf32, #tpu.memory_space<vmem>>, vector<4x8x16xf32>
      tpu.vector_store %arg10[%c0_36, %c0_37, %c0_38], %69 {strides = array<i32>} : memref<4x8x16xf32, #tpu.memory_space<vmem>>, vector<4x8x16xf32>,
    } else {
    }
    %c0 = arith.constant 0 : index
    %c0_1 = arith.constant 0 : index
    %c0_2 = arith.constant 0 : index
    %c0_3 = arith.constant 0 : index
    %3 = vector.load %arg2[%c0, %c0_1, %c0_2, %c0_3] : memref<1x4x16x16xf32, #tpu.memory_space<vmem>>, vector<1x4x16x16xf32>
    %4 = vector.shape_cast %3 : vector<1x4x16x16xf32> to vector<4x16x16xf32>
    %c0_4 = arith.constant 0 : index
    %c0_5 = arith.constant 0 : index
    %5 = vector.load %arg4[%c0_4, %c0_5] : memref<16x16xf32, #tpu.memory_space<vmem>>, vector<16x16xf32>
    %6 = vector.shape_cast %5 : vector<16x16xf32> to vector<1x16x16xf32>
    %7 = vector.broadcast %6 : vector<1x16x16xf32> to vector<4x16x16xf32>
    %8 = arith.addf %4, %7 : vector<4x16x16xf32>
    %cst = arith.constant dense<0xFF800000> : vector<4x16xf32>
    %9 = vector.multi_reduction <maximumf>, %8, %cst [1] : vector<4x16x16xf32> to vector<4x16xf32>
    %10 = vector.shape_cast %9 : vector<4x16xf32> to vector<4x1x16xf32>
    %11 = vector.broadcast %10 : vector<4x1x16xf32> to vector<4x16x16xf32>
    %12 = arith.subf %8, %11 : vector<4x16x16xf32>
    %13 = math.exp %12 : vector<4x16x16xf32>
    %cst_6 = arith.constant dense<0.000000e+00> : vector<4x16xf32>
    %14 = vector.multi_reduction <add>, %13, %cst_6 [1] : vector<4x16x16xf32> to vector<4x16xf32>
    %15 = vector.shape_cast %14 : vector<4x16xf32> to vector<4x1x16xf32>
    %16 = tpu.reciprocal %15 {approx = true} : vector<4x1x16xf32> -> vector<4x1x16xf32>
    %c0_7 = arith.constant 0 : index
    %c0_8 = arith.constant 0 : index
    %c0_9 = arith.constant 0 : index
    %17 = vector.load %arg10[%c0_7, %c0_8, %c0_9] : memref<4x8x16xf32, #tpu.memory_space<vmem>>, vector<1x8x16xf32>
    %18 = vector.shape_cast %17 : vector<1x8x16xf32> to vector<8x16xf32>
    %19 = vector.extract_strided_slice %13 {offsets = [0, 0, 0], sizes = [1, 16, 16], strides = [1, 1, 1]} : vector<4x16x16xf32> to vector<1x16x16xf32>
    %20 = vector.shape_cast %19 : vector<1x16x16xf32> to vector<16x16xf32>
    %cst_10 = arith.constant dense<0.000000e+00> : vector<8x16xf32>
    %21 = tpu.matmul %18, %20, %cst_10 {dimension_numbers = #tpu.dot_dimension_numbers<[1], [0], [0], [1], [0, 0, 1, 1], [], []>} : vector<8x16xf32>, vector<16x16xf32>, vector<8x16xf32> -> vector<8x16xf32>
    %22 = vector.extract_strided_slice %16 {offsets = [0, 0, 0], sizes = [1, 1, 16], strides = [1, 1, 1]} : vector<4x1x16xf32> to vector<1x1x16xf32>
    %23 = vector.shape_cast %22 : vector<1x1x16xf32> to vector<1x16xf32>
    %24 = vector.broadcast %23 : vector<1x16xf32> to vector<8x16xf32>
    %25 = arith.mulf %21, %24 : vector<8x16xf32>
    %c1 = arith.constant 1 : index
    %c0_11 = arith.constant 0 : index
    %c0_12 = arith.constant 0 : index
    %26 = vector.load %arg10[%c1, %c0_11, %c0_12] : memref<4x8x16xf32, #tpu.memory_space<vmem>>, vector<1x8x16xf32>
    %27 = vector.shape_cast %26 : vector<1x8x16xf32> to vector<8x16xf32>
    %28 = vector.extract_strided_slice %13 {offsets = [1, 0, 0], sizes = [1, 16, 16], strides = [1, 1, 1]} : vector<4x16x16xf32> to vector<1x16x16xf32>
    %29 = vector.shape_cast %28 : vector<1x16x16xf32> to vector<16x16xf32>
    %cst_13 = arith.constant dense<0.000000e+00> : vector<8x16xf32>
    %30 = tpu.matmul %27, %29, %cst_13 {dimension_numbers = #tpu.dot_dimension_numbers<[1], [0], [0], [1], [0, 0, 1, 1], [], []>} : vector<8x16xf32>, vector<16x16xf32>, vector<8x16xf32> -> vector<8x16xf32>
    %31 = vector.extract_strided_slice %16 {offsets = [1, 0, 0], sizes = [1, 1, 16], strides = [1, 1, 1]} : vector<4x1x16xf32> to vector<1x1x16xf32>
    %32 = vector.shape_cast %31 : vector<1x1x16xf32> to vector<1x16xf32>
    %33 = vector.broadcast %32 : vector<1x16xf32> to vector<8x16xf32>
    %34 = arith.mulf %30, %33 : vector<8x16xf32>
    %c2 = arith.constant 2 : index
    %c0_14 = arith.constant 0 : index
    %c0_15 = arith.constant 0 : index
    %35 = vector.load %arg10[%c2, %c0_14, %c0_15] : memref<4x8x16xf32, #tpu.memory_space<vmem>>, vector<1x8x16xf32>
    %36 = vector.shape_cast %35 : vector<1x8x16xf32> to vector<8x16xf32>
    %37 = vector.extract_strided_slice %13 {offsets = [2, 0, 0], sizes = [1, 16, 16], strides = [1, 1, 1]} : vector<4x16x16xf32> to vector<1x16x16xf32>
    %38 = vector.shape_cast %37 : vector<1x16x16xf32> to vector<16x16xf32>
    %cst_16 = arith.constant dense<0.000000e+00> : vector<8x16xf32>
    %39 = tpu.matmul %36, %38, %cst_16 {dimension_numbers = #tpu.dot_dimension_numbers<[1], [0], [0], [1], [0, 0, 1, 1], [], []>} : vector<8x16xf32>, vector<16x16xf32>, vector<8x16xf32> -> vector<8x16xf32>
    %40 = vector.extract_strided_slice %16 {offsets = [2, 0, 0], sizes = [1, 1, 16], strides = [1, 1, 1]} : vector<4x1x16xf32> to vector<1x1x16xf32>
    %41 = vector.shape_cast %40 : vector<1x1x16xf32> to vector<1x16xf32>
    %42 = vector.broadcast %41 : vector<1x16xf32> to vector<8x16xf32>
    %43 = arith.mulf %39, %42 : vector<8x16xf32>
    %c3 = arith.constant 3 : index
    %c0_17 = arith.constant 0 : index
    %c0_18 = arith.constant 0 : index
    %44 = vector.load %arg10[%c3, %c0_17, %c0_18] : memref<4x8x16xf32, #tpu.memory_space<vmem>>, vector<1x8x16xf32>
    %45 = vector.shape_cast %44 : vector<1x8x16xf32> to vector<8x16xf32>
    %46 = vector.extract_strided_slice %13 {offsets = [3, 0, 0], sizes = [1, 16, 16], strides = [1, 1, 1]} : vector<4x16x16xf32> to vector<1x16x16xf32>
    %47 = vector.shape_cast %46 : vector<1x16x16xf32> to vector<16x16xf32>
    %cst_19 = arith.constant dense<0.000000e+00> : vector<8x16xf32>
    %48 = tpu.matmul %45, %47, %cst_19 {dimension_numbers = #tpu.dot_dimension_numbers<[1], [0], [0], [1], [0, 0, 1, 1], [], []>} : vector<8x16xf32>, vector<16x16xf32>, vector<8x16xf32> -> vector<8x16xf32>
    %49 = vector.extract_strided_slice %16 {offsets = [3, 0, 0], sizes = [1, 1, 16], strides = [1, 1, 1]} : vector<4x1x16xf32> to vector<1x1x16xf32>
    %50 = vector.shape_cast %49 : vector<1x1x16xf32> to vector<1x16xf32>
    %51 = vector.broadcast %50 : vector<1x16xf32> to vector<8x16xf32>
    %52 = arith.mulf %48, %51 : vector<8x16xf32>
    %53 = tpu.concatenate %25, %34, %43, %52 in 0 : vector<8x16xf32>, vector<8x16xf32>, vector<8x16xf32>, vector<8x16xf32> -> vector<32x16xf32>
    %c0_20 = arith.constant 0 : index
    %c0_21 = arith.constant 0 : index
    %54 = vector.load %arg7[%c0_20, %c0_21] : memref<32x32xf32, #tpu.memory_space<vmem>>, vector<32x32xf32>
    %cst_22 = arith.constant dense<0.000000e+00> : vector<32x16xf32>
    %55 = tpu.matmul %54, %53, %cst_22 {dimension_numbers = #tpu.dot_dimension_numbers<[1], [0], [0], [1], [0, 0, 1, 1], [], []>} : vector<32x32xf32>, vector<32x16xf32>, vector<32x16xf32> -> vector<32x16xf32>
    %c0_23 = arith.constant 0 : index
    %c0_24 = arith.constant 0 : index
    %56 = vector.load %arg8[%c0_23, %c0_24] : memref<32x1xf32, #tpu.memory_space<vmem>>, vector<32x1xf32>
    %57 = vector.broadcast %56 : vector<32x1xf32> to vector<32x16xf32>
    %58 = arith.addf %55, %57 : vector<32x16xf32>
    %c0_25 = arith.constant 0 : index
    %c0_26 = arith.constant 0 : index
    %c0_27 = arith.constant 0 : index
    %59 = vector.load %arg9[%c0_25, %c0_26, %c0_27] : memref<1x32x16xf32, #tpu.memory_space<vmem>>, vector<1x32x16xf32>
    %60 = vector.shape_cast %59 : vector<1x32x16xf32> to vector<32x16xf32>
    %61 = vector.shape_cast %58 : vector<32x16xf32> to vector<1x32x16xf32>
    tpu.vector_store %arg9[%c0_25, %c0_26, %c0_27], %61 {strides = array<i32>} : memref<1x32x16xf32, #tpu.memory_space<vmem>>, vector<1x32x16xf32>,
    return
  }
  func.func @transform_0(%arg0: i32, %arg1: i32) -> (i32, i32, i32, i32) {
    %c0_i32 = arith.constant 0 : i32
    %c0_i32_0 = arith.constant 0 : i32
    %c0_i32_1 = arith.constant 0 : i32
    return %arg0, %c0_i32, %c0_i32_0, %arg1 : i32, i32, i32, i32
  }
  func.func @transform_1(%arg0: i32, %arg1: i32) -> (i32, i32, i32) {
    %c0_i32 = arith.constant 0 : i32
    %c0_i32_0 = arith.constant 0 : i32
    %c0_i32_1 = arith.constant 0 : i32
    return %arg0, %c0_i32, %c0_i32_0 : i32, i32, i32
  }
  func.func @transform_2(%arg0: i32, %arg1: i32) -> (i32, i32) {
    %c0_i32 = arith.constant 0 : i32
    %c0_i32_0 = arith.constant 0 : i32
    return %c0_i32, %arg1 : i32, i32
  }
  func.func @transform_3(%arg0: i32, %arg1: i32) -> (i32, i32) {
    %c0_i32 = arith.constant 0 : i32
    %c0_i32_0 = arith.constant 0 : i32
    %c0_i32_1 = arith.constant 0 : i32
    return %c0_i32, %c0_i32_0 : i32, i32
  }
  func.func @transform_4(%arg0: i32, %arg1: i32) -> (i32, i32) {
    %c0_i32 = arith.constant 0 : i32
    %c0_i32_0 = arith.constant 0 : i32
    %c0_i32_1 = arith.constant 0 : i32
    return %c0_i32, %c0_i32_0 : i32, i32
  }
  func.func @transform_5(%arg0: i32, %arg1: i32) -> (i32, i32) {
    %c0_i32 = arith.constant 0 : i32
    %c0_i32_0 = arith.constant 0 : i32
    %c0_i32_1 = arith.constant 0 : i32
    return %c0_i32, %c0_i32_0 : i32, i32
  }
  func.func @transform_6(%arg0: i32, %arg1: i32) -> (i32, i32) {
    %c0_i32 = arith.constant 0 : i32
    %c0_i32_0 = arith.constant 0 : i32
    %c0_i32_1 = arith.constant 0 : i32
    return %c0_i32, %c0_i32_0 : i32, i32
  }
  func.func @transform_7(%arg0: i32, %arg1: i32) -> (i32, i32, i32) {
    %c0_i32 = arith.constant 0 : i32
    %c0_i32_0 = arith.constant 0 : i32
    return %arg0, %c0_i32, %arg1 : i32, i32, i32
  }
}

</mosaic_0001>

<bundles_post_ra>
// kernel: tpu_custom_call.1
= control target key start
LH: loop header
LB: loop body
LE: loop exit
PB: predicated region body
PF: predicated region fallthrough
CT: control target
= control target key end

     0   :  { %12 = vsyncpa [#allocation4], 0  ;;  %s1281_s0 = inlined_call_operand.vmem [shape: f32[2,4,16,16], index: 0, kind: input, shape index: {}]   ;;  %s1282_s1 = inlined_call_operand.vmem [shape: f32[2,32,16], index: 1, kind: input, shape index: {}]   ;;  %s1283_s2 = inlined_call_operand.hbm [shape: f32[16,16], index: 2, kind: input, shape index: {}]   ;;  %s1284_s3 = inlined_call_operand.vmem [shape: f32[32,32], index: 3, kind: input, shape index: {}]   ;;  %s1285_s4 = inlined_call_operand.vmem [shape: f32[32,1], index: 4, kind: input, shape index: {}]   ;;  %s1286_s5 = inlined_call_operand.hbm [shape: f32[32,32], index: 5, kind: input, shape index: {}]   ;;  %s1287_s6 = inlined_call_operand.vmem [shape: f32[32,1], index: 6, kind: input, shape index: {}]   ;;  %s1288_s7 = inlined_call_operand.vmem [shape: f32[2,32,16], index: 7, kind: output, shape index: {}]  }
   0x1   :  { %13 = vsyncpa [#allocation6], 0  ;;  %s1122_s24 = smov 0   ;;  %s1124_s25 = smov 0  }
   0x2   :  { %s1126_s26 = smov 0  }
   0x3 LB: > { %s870_s27 = sadd.s32 4294967295, %s1075_s26   ;;  %s31_s28 = sadd.s32 1, %s1071_s25  ;;  %s1075_s26 = sphi %s1126_s26, %s19_s26   ;;  %s1071_s25 = sphi %s1124_s25, %s1292_s25   ;;  %s1067_s24 = sphi %s1122_s24, %s1291_s24  }
   0x4   : > { %p33_p0 = scmp.ge.s32.totalorder %s31_s28, 2  ;;  %p872_p1 = scmp.ge.s32.totalorder %s1075_s26, 1 }
   0x5   : > { %p228_p2 = scmp.lt.s32.totalorder %s1075_s26, 3  ;;  %p1147_p4 = scmp.eq.s32.totalorder %s870_s27, 0 }
   0x6   : > { %s1294_s28 = smov (%p33_p0, %s31_s28), 0  ;;  %s241_s10 = sshll.u32 %s1283_s2, 4  ;;  %s242_s10 = int_to_ptr.hbm [resolvable:$true] %s241_s10 }
   0x7   : > { %p1143_p3 = pnand %p872_p1, %p228_p2  ;;  %s1077_s11 = smov [#allocation3]  }
   0x8   : > { %s243_s12 = sshll.u32 %s1077_s11, 4  ;;  %s261_s15 = sshll.u32 %s1286_s5, 4  ;;  %s244_s12 = int_to_ptr.vmem [resolvable:$true] %s243_s12  ;;  %s262_s15 = int_to_ptr.hbm [resolvable:$true] %s261_s15 }
   0x9   : > { %p918_p5 = pneg %p1143_p3  ;;  %s1078_s16 = smov 128  }
   0xa   : > { %s1079_s17 = smov 8   ;;  %s1080_s18 = smov [#allocation5]  }
   0xb   : > { %p919_p6 = pnand %p1147_p4, %p918_p5  ;;  %s263_s19 = sshll.u32 %s1080_s18, 4  ;;  %s264_s19 = int_to_ptr.vmem [resolvable:$true] %s263_s19 }
   0xc   : > { %301 = sbr.rel (%p1143_p3) target bundleno = 475 (0x1db), region = 48 }
   0xd   : > { %921 = dma.hbm_to_vmem [thread:$0]  (!%p919_p6), %s242_s10, 256, %s244_s12, [#allocation4], %s1078_s16, %s1078_s16, %s1079_s17  }
   0xe   : > { %924 = dma.hbm_to_vmem [thread:$0]  (!%p919_p6), %s262_s15, 512, %s264_s19, [#allocation6], %s1078_s16, %s1078_s16, %s1079_s17  }
  0x11   : > { %1058 = dma.done.wait (%p1147_p4), [#allocation4], 256  }
  0x12   : > { %1060 = vsyncadd (%p1147_p4), [#allocation4], 4294967040 }
  0x13   : > { %1062 = dma.done.wait (%p1147_p4), [#allocation6], 512  }
  0x14   : > { %1064 = vsyncadd (%p1147_p4), [#allocation6], 4294966784  ;;  %p350_p7 = scmp.lt.s32.totalorder %s1067_s24, 1  ;;  %v1081_v0 = vmov 0   ;;  %v384_v3 = vld [vmem:[%s1285_s4 + $0x8] sm:$0xff]  ;;  %v385_v5 = vld [vmem:[%s1285_s4 + $0x10] sm:$0xff] }
  0x15   : > { %958 = vset.pattern.permute.xlu0 %v1081_v0  ;;  %959 = vset.pattern.permute.xlu1 %v1081_v0  ;;  %v375_v7 = vld [vmem:[%s1284_s3] sm:$0xff]  ;;  %vm407_vm0 = vcmask 261120   ;;  %v378_v8 = vld [vmem:[%s1284_s3 + $0x18] sm:$0xff]  ;;  %v376_v11 = vld [vmem:[%s1284_s3 + $0x8] sm:$0xff]  ;;  %vm449_vm1 = vcmask 130048  }
  0x16   : > { %s1296_s24 = smov (!%p350_p7, %s1067_s24), 1  ;;  %960 = vset.pattern.permute.xlu2 %v1081_v0  ;;  %394 = vperm.xlu0 %958, %v384_v3   ;;  %v383_v9 = vld [vmem:[%s1285_s4] sm:$0xff]  ;;  %v386_v10 = vld [vmem:[%s1285_s4 + $0x18] sm:$0xff]  ;;  %v682_v12 = vld [vmem:[%s1287_s6 + $0x10] sm:$0xff] }
  0x17   : > { %s900_s20 = sshll.u32 %s1296_s24, 5  ;;  %399 = vperm.xlu1 %959, %v385_v5   ;;  %v683_v13 = vld [vmem:[%s1287_s6 + $0x18] sm:$0xff]  ;;  %v377_v14 = vld [vmem:[%s1284_s3 + $0x10] sm:$0xff]  ;;  %s899_s30 = sshll.u32 %s1296_s24, 6  ;;  %v462_v17 = vld [vmem:[#allocation3] sm:$0xff] }
  0x18   : > { %s362_s23 = scalar_lea.vmem %s1282_s1, %s900_s20  ;;  %s1219_s10 = scalar_lea.vmem %s1281_s0, %s899_s30  ;;  %v463_v18 = vld [vmem:[#allocation3 + $0x8] sm:$0xff] }
  0x19   : > { %v382_v1 = vld [vmem:[%s362_s23 + $0x18] sm:$0xff]  ;;  %v381_v2 = vld [vmem:[%s362_s23 + $0x10] sm:$0xff]  ;;  %v380_v4 = vld [vmem:[%s362_s23 + $0x8] sm:$0xff]  ;;  %s370_s17 = scalar_lea.vmem %s1288_s7, %s900_s20 }
  0x1a   : > { %432 = vmatpush.msra.mxu0 %v382_v1  ;;  %902 = vmatpush.msra.mxu1 %v382_v1  ;;  %v379_v6 = vld [vmem:[%s362_s23] sm:$0xff]  ;;  %v455_v16 = vld [vmem:[%s1219_s10 + $0x8] sm:$0xff]  ;;  %v456_v25 = vld [vmem:[%s1219_s10 + $0x10] sm:$0xff] }
  0x1b   : > { %v454_v15 = vld [vmem:[%s1219_s10] sm:$0xff]  ;;  %v465_v20 = vadd.f32 %v463_v18, %v455_v16  ;;  %v457_v26 = vld [vmem:[%s1219_s10 + $0x18] sm:$0xff]  ;;  %v466_v28 = vadd.f32 %v462_v17, %v456_v25  ;;  %v460_v33 = vld [vmem:[%s1219_s10 + $0x30] sm:$0xff] }
  0x1c   : > { %433 = vmatpush.msra.mxu0 %v381_v2  ;;  %903 = vmatpush.msra.mxu1 %v381_v2  ;;  %v464_v19 = vadd.f32 %v462_v17, %v454_v15  ;;  %v467_v29 = vadd.f32 %v463_v18, %v457_v26  ;;  %v461_v34 = vld [vmem:[%s1219_s10 + $0x38] sm:$0xff]  ;;  %v470_v36 = vadd.f32 %v462_v17, %v460_v33  ;;  %v458_v45 = vld [vmem:[%s1219_s10 + $0x20] sm:$0xff]  ;;  %v459_v46 = vld [vmem:[%s1219_s10 + $0x28] sm:$0xff] }
  0x1d   : > { %v474_v22 = vsel %vm449_vm1, %v465_v20, -inf  ;;  %v482_v31 = vsel %vm449_vm1, %v466_v28, -inf  ;;  %v471_v37 = vadd.f32 %v463_v18, %v461_v34  ;;  %v468_v48 = vadd.f32 %v462_v17, %v458_v45 }
  0x1e   : > { %434 = vmatpush.msra.mxu0 %v380_v4  ;;  %904 = vmatpush.msra.mxu1 %v380_v4  ;;  %v473_v21 = vsel %vm449_vm1, %v464_v19, -inf  ;;  %v483_v32 = vsel %vm449_vm1, %v467_v29, -inf  ;;  %v500_v41 = vsel %vm449_vm1, %v470_v36, -inf  ;;  %v469_v49 = vadd.f32 %v463_v18, %v459_v46 }
  0x1f   : > { %389 = vperm.xlu0 %958, %v383_v9   ;;  %404 = vperm.xlu1 %959, %v386_v10   ;;  %v475_v23 = vmax.f32 %v473_v21, %v474_v22  ;;  %v484_v35 = vmax.f32 %v482_v31, %v483_v32  ;;  %v501_v42 = vsel %vm449_vm1, %v471_v37, -inf  ;;  %v491_v53 = vsel %vm449_vm1, %v468_v48, -inf }
  0x20   : > { %435 = vmatpush.msra.mxu0 %v379_v6  ;;  %905 = vmatpush.msra.mxu1 %v379_v6  ;;  %v502_v43 = vmax.f32 %v500_v41, %v501_v42  ;;  %v492_v54 = vsel %vm449_vm1, %v469_v49, -inf }
  0x21   : > { %885 = vmatmul.msk.f32.vlgmr.msra.gmra.mxu0 %vm407_vm0, %v375_v7  ;;  %888 = vmatmul.msk.f32.vlgmr.msra.gmra.mxu1 %vm407_vm0, %v378_v8  ;;  %v476_v24 = vrot.slane %v475_v23, 4  ;;  %v485_v39 = vrot.slane %v484_v35, 4  ;;  %v493_v58 = vmax.f32 %v491_v53, %v492_v54 }
  0x22   : > { %v503_v50 = vrot.slane %v502_v43, 4 }
  0x23   : > { %v477_v27 = vmax.f32 %v475_v23, %v476_v24  ;;  %v486_v44 = vmax.f32 %v484_v35, %v485_v39  ;;  %v494_v63 = vrot.slane %v493_v58, 4 }
  0x24   : > { %v504_v55 = vmax.f32 %v502_v43, %v503_v50 }
  0x25   : > { %v478_v30 = vrot.slane %v477_v27, 2  ;;  %v487_v51 = vrot.slane %v486_v44, 2  ;;  %v495_v2 = vmax.f32 %v493_v58, %v494_v63 }
  0x26   : > { %v505_v60 = vrot.slane %v504_v55, 2 }
  0x27   : > { %696 = vperm.xlu0 %958, %v682_v12   ;;  %701 = vperm.xlu1 %959, %v683_v13   ;;  %v479_v38 = vmax.f32 %v477_v27, %v478_v30  ;;  %v488_v57 = vmax.f32 %v486_v44, %v487_v51  ;;  %v496_v5 = vrot.slane %v495_v2, 2 }
  0x28   : > { %v506_v0 = vmax.f32 %v504_v55, %v505_v60 }
  0x29   : > { %886 = vmatmul.msk.f32.gmra.mxu0 %vm407_vm0, %v376_v11  ;;  %v480_v40 = vrot.slane %v479_v38, 1  ;;  %v489_v62 = vrot.slane %v488_v57, 1  ;;  %v497_v9 = vmax.f32 %v495_v2, %v496_v5 }
  0x2a   : > { %v507_v3 = vrot.slane %v506_v0, 1 }
  0x2b   : > { %v481_v47 = vmax.f32 %v479_v38, %v480_v40  ;;  %v490_v1 = vmax.f32 %v488_v57, %v489_v62 }
  0x2c   : > { %v508_v6 = vmax.f32 %v506_v0, %v507_v3 }
  0x2d   : > { %v510_v52 = vsub.f32 %v465_v20, %v481_v47  ;;  %v509_v56 = vsub.f32 %v464_v19, %v481_v47  ;;  %v512_v4 = vsub.f32 %v467_v29, %v490_v1  ;;  %v511_v8 = vsub.f32 %v466_v28, %v490_v1 }
  0x2e   : > { %v516_v12 = vsub.f32 %v471_v37, %v508_v6  ;;  %v515_v17 = vsub.f32 %v470_v36, %v508_v6 }
  0x2f   : > { %v519_v59 = vmul.f32 1.442695, %v510_v52  ;;  %v517_v61 = vmul.f32 1.442695, %v509_v56  ;;  %v523_v7 = vmul.f32 1.442695, %v512_v4 }
  0x30   : > { %v521_v13 = vmul.f32 1.442695, %v511_v8  ;;  %v531_v15 = vmul.f32 1.442695, %v516_v12  ;;  %v529_v19 = vmul.f32 1.442695, %v515_v17 }
  0x31   : > { %887 = vmatmul.msk.f32.gmra.mxu0 %vm407_vm0, %v377_v14  ;;  %961 = vpow2.f32 %v519_v59  ;;  %v498_v14 = vrot.slane %v497_v9, 1 }
  0x32   : > { %963 = vpow2.f32 %v517_v61 }
  0x33   : > { %965 = vpow2.f32 %v523_v7  ;;  %v499_v16 = vmax.f32 %v497_v9, %v498_v14 }
  0x34   : > { %967 = vpow2.f32 %v521_v13 }
  0x35   : > { %969 = vpow2.f32 %v531_v15  ;;  %v514_v18 = vsub.f32 %v469_v49, %v499_v16  ;;  %v513_v21 = vsub.f32 %v468_v48, %v499_v16 }
  0x36   : > { %971 = vpow2.f32 %v529_v19 }
  0x37   : > { %v962_v10 = vpop.eup %961  ;;  %v527_v22 = vmul.f32 1.442695, %v514_v18  ;;  %v525_v24 = vmul.f32 1.442695, %v513_v21 }
  0x38   : > { %v964_v11 = vpop.eup %963  ;;  %591 = vmatpush.msrb.mxu1 %v962_v10  ;;  %v534_v30 = vsel %vm449_vm1, %v962_v10, 0.0 }
  0x39   : > { %v966_v20 = vpop.eup %965  ;;  %973 = vpow2.f32 %v527_v22  ;;  %v533_v31 = vsel %vm449_vm1, %v964_v11, 0.0  ;;  %v680_v22 = vld [vmem:[%s1287_s6] sm:$0xff] }
  0x3a   : > { %592 = vmatpush.msrb.mxu1 %v964_v11  ;;  %617 = vmatpush.msra.mxu2 %v966_v20  ;;  %v968_v23 = vpop.eup %967  ;;  %975 = vpow2.f32 %v525_v24  ;;  %v535_v33 = vadd.f32 %v534_v30, %v533_v31  ;;  %v543_v48 = vsel %vm449_vm1, %v966_v20, 0.0  ;;  %v681_v24 = vld [vmem:[%s1287_s6 + $0x8] sm:$0xff]  ;;  %v677_v31 = vld [vmem:[#allocation5 + $0x8] sm:$0xff] }
  0x3b   : > { %v970_v25 = vpop.eup %969  ;;  %v542_v49 = vsel %vm449_vm1, %v968_v23, 0.0  ;;  %686 = vperm.xlu2 %960, %v680_v22  }
  0x3c   : > { %618 = vmatpush.msra.mxu2 %v968_v23  ;;  %669 = vmatpush.msra.mxu1 %v970_v25  ;;  %v972_v26 = vpop.eup %971  ;;  %v544_v50 = vadd.f32 %v543_v48, %v542_v49  ;;  %v561_v54 = vsel %vm449_vm1, %v970_v25, 0.0  ;;  %v536_v0 = vrot.slane %v535_v33, 4 }
  0x3d   : > { %v560_v53 = vsel %vm449_vm1, %v972_v26, 0.0 }
  0x3e   : > { %670 = vmatpush.msra.mxu1 %v972_v26  ;;  %v562_v56 = vadd.f32 %v561_v54, %v560_v53  ;;  %v545_v63 = vrot.slane %v544_v50, 4  ;;  %v537_v4 = vadd.f32 %v536_v0, %v535_v33  ;;  %v678_v33 = vld [vmem:[#allocation5 + $0x10] sm:$0xff] }
  0x3f   : > { %v974_v29 = vpop.eup %973 }
  0x40   : > { %v976_v32 = vpop.eup %975  ;;  %643 = vmatpush.msrb.mxu2 %v974_v29  ;;  %v552_v51 = vsel %vm449_vm1, %v974_v29, 0.0  ;;  %v563_v57 = vrot.slane %v562_v56, 4  ;;  %v546_v3 = vadd.f32 %v545_v63, %v544_v50  ;;  %v538_v8 = vrot.slane %v537_v4, 2 }
  0x41   : > { %v551_v52 = vsel %vm449_vm1, %v976_v32, 0.0 }
  0x42   : > { %644 = vmatpush.msrb.mxu2 %v976_v32  ;;  %v553_v55 = vadd.f32 %v552_v51, %v551_v52  ;;  %v564_v58 = vadd.f32 %v563_v57, %v562_v56  ;;  %v547_v7 = vrot.slane %v546_v3, 2  ;;  %v539_v12 = vadd.f32 %v538_v8, %v537_v4  ;;  %v676_v32 = vld [vmem:[#allocation5] sm:$0xff] }
  0x43   : > { %691 = vperm.xlu2 %960, %v681_v24  }
  0x44   : > { %v565_v59 = vrot.slane %v564_v58, 2  ;;  %v554_v61 = vrot.slane %v553_v55, 4  ;;  %v548_v10 = vadd.f32 %v547_v7, %v546_v3  ;;  %v540_v17 = vrot.slane %v539_v12, 1 }
  0x46   : > { %v566_v60 = vadd.f32 %v565_v59, %v564_v58  ;;  %v555_v1 = vadd.f32 %v554_v61, %v553_v55  ;;  %v549_v15 = vrot.slane %v548_v10, 1  ;;  %v541_v20 = vadd.f32 %v540_v17, %v539_v12 }
  0x48   : > { %v567_v62 = vrot.slane %v566_v60, 1  ;;  %v556_v5 = vrot.slane %v555_v1, 2  ;;  %v550_v19 = vadd.f32 %v549_v15, %v548_v10 }
  0x4a   : > { %v568_v2 = vadd.f32 %v567_v62, %v566_v60  ;;  %v557_v9 = vadd.f32 %v556_v5, %v555_v1 }
  0x4c   : > { %977 = vrcp.f32 %v568_v2  ;;  %v558_v13 = vrot.slane %v557_v9, 1 }
  0x4e   : > { %v559_v18 = vadd.f32 %v558_v13, %v557_v9 }
  0x50   : > { %979 = vrcp.f32 %v559_v18 }
  0x51   : > { %981 = vrcp.f32 %v550_v19 }
  0x52   : > { %v978_v11 = vpop.eup %977  ;;  %983 = vrcp.f32 %v541_v20 }
  0x56   : > { %v980_v23 = vpop.eup %979 }
  0x57   : > { %v982_v25 = vpop.eup %981 }
  0x88   : > { %v395_v27 = vpop.permute.xlu0 %394 }
  0x89   : > { %v400_v28 = vpop.permute.xlu1 %399 }
  0x91   : > { %v390_v34 = vpop.permute.xlu0 %389  ;;  %v405_v37 = vpop.permute.xlu1 %404 }
  0x9e   : > { %v437_v35 = vpop.f32.mrf.mxu0  ;;  %v446_v38 = vpop.f32.mrf.mxu1 }
  0x9f   : > { %v438_v36 = vadd.f32 %v437_v35, %v390_v34  ;;  %v447_v39 = vadd.f32 %v446_v38, %v405_v37  ;;  %v679_v34 = vld [vmem:[#allocation5 + $0x18] sm:$0xff]  ;;  %v687_v35 = vpop.permute.xlu2 %686 }
  0xa1   : > { %450 = vst.msk [vmem:[#allocation2] sm:$0xff] %vm449_vm1, %v438_v36 }
  0xa2   : > { %453 = vst.msk [vmem:[#allocation2 + $0x18] sm:$0xff] %vm449_vm1, %v447_v39 }
  0xa6   : > { %v440_v40 = vpop.f32.mrf.mxu0 }
  0xa7   : > { %v441_v41 = vadd.f32 %v440_v40, %v395_v27  ;;  %v692_v36 = vpop.permute.xlu2 %691 }
  0xa8   : > { %v573_v42 = vld [vmem:[#allocation2] sm:$0xff] }
  0xa9   : > { %451 = vst.msk [vmem:[#allocation2 + $0x8] sm:$0xff] %vm449_vm1, %v441_v41  ;;  %889 = vmatmul.msk.f32.vlgmr.msrb.gmra.mxu1 %vm449_vm1, %v573_v42  ;;  %v651_v44 = vld [vmem:[#allocation2 + $0x18] sm:$0xff]  ;;  %v697_v41 = vpop.permute.xlu0 %696 }
  0xae   : > { %v443_v43 = vpop.f32.mrf.mxu0 }
  0xaf   : > { %v444_v45 = vadd.f32 %v443_v43, %v400_v28  ;;  %v984_v28 = vpop.eup %983 }
  0xb0   : > { %v599_v46 = vld [vmem:[#allocation2 + $0x8] sm:$0xff] }
  0xb1   : > { %452 = vst.msk [vmem:[#allocation2 + $0x10] sm:$0xff] %vm449_vm1, %v444_v45  ;;  %890 = vmatmul.msk.f32.vlgmr.msra.gmra.mxu2 %vm449_vm1, %v599_v46  ;;  %892 = vmatmul.msk.f32.vlgmr.msra.gmra.mxu1 %vm449_vm1, %v651_v44  ;;  %v702_v44 = vpop.permute.xlu1 %701 }
  0xb8   : > { %v625_v47 = vld [vmem:[#allocation2 + $0x10] sm:$0xff] }
  0xb9   : > { %891 = vmatmul.msk.f32.vlgmr.msrb.gmra.mxu2 %vm449_vm1, %v625_v47 }
 0x126   : > { %v594_v6 = vpop.f32.mrf.mxu1 }
 0x127   : > { %v597_v30 = vmul.f32 %v984_v28, %v594_v6 }
 0x12e   : > { %v672_v14 = vpop.f32.mrf.mxu1 }
 0x12f   : > { %v675_v16 = vmul.f32 %v978_v11, %v672_v14 }
 0x131   : > { %729 = vmatpush.msra.mxu2 %v675_v16  ;;  %906 = vmatpush.msra.mxu3 %v675_v16 }
 0x134   : > { %v620_v21 = vpop.f32.mrf.mxu2 }
 0x135   : > { %v623_v29 = vmul.f32 %v982_v25, %v620_v21 }
 0x13c   : > { %v646_v26 = vpop.f32.mrf.mxu2 }
 0x13d   : > { %v649_v27 = vmul.f32 %v980_v23, %v646_v26 }
 0x13f   : > { %730 = vmatpush.msra.mxu2 %v649_v27  ;;  %907 = vmatpush.msra.mxu3 %v649_v27 }
 0x141   : > { %731 = vmatpush.msra.mxu2 %v623_v29  ;;  %908 = vmatpush.msra.mxu3 %v623_v29 }
 0x143   : > { %732 = vmatpush.msra.mxu2 %v597_v30  ;;  %909 = vmatpush.msra.mxu3 %v597_v30 }
 0x144   : > { %894 = vmatmul.msk.f32.vlgmr.msra.gmra.mxu3 %vm407_vm0, %v677_v31  ;;  %893 = vmatmul.msk.f32.vlgmr.msra.gmra.mxu2 %vm407_vm0, %v676_v32 }
 0x14c   : > { %895 = vmatmul.msk.f32.gmra.mxu3 %vm407_vm0, %v678_v33 }
 0x154   : > { %896 = vmatmul.msk.f32.gmra.mxu3 %vm407_vm0, %v679_v34 }
 0x1c7   : > { %v737_v37 = vpop.f32.mrf.mxu3  ;;  %v734_v38 = vpop.f32.mrf.mxu2 }
 0x1c8   : > { %v738_v39 = vadd.f32 %v737_v37, %v692_v36  ;;  %v735_v40 = vadd.f32 %v734_v38, %v687_v35 }
 0x1ca   : > { %747 = vst.msk [vmem:[%s370_s17 + $0x8] sm:$0xff] %vm449_vm1, %v738_v39 }
 0x1cb   : > { %746 = vst.msk [vmem:[%s370_s17] sm:$0xff] %vm449_vm1, %v735_v40 }
 0x1cf   : > { %v740_v42 = vpop.f32.mrf.mxu3 }
 0x1d0   : > { %v741_v43 = vadd.f32 %v740_v42, %v697_v41 }
 0x1d2   : > { %748 = vst.msk [vmem:[%s370_s17 + $0x10] sm:$0xff] %vm449_vm1, %v741_v43 }
 0x1d7   : > { %v743_v45 = vpop.f32.mrf.mxu3 }
 0x1d8   : > { %v744_v46 = vadd.f32 %v743_v45, %v702_v44 }
 0x1da   : > { %749 = vst.msk [vmem:[%s370_s17 + $0x18] sm:$0xff] %vm449_vm1, %v744_v46 }
 0x1db PF: > { %s19_s26 = sadd.s32 1, %s1075_s26   ;;  %s1291_s24 = smov %s1071_s25 }
 0x1dc   : > { %p16_p8 = scmp.ge.s32.totalorder %s19_s26, 4   ;;  %s1292_s25 = smov %s1294_s28 }
 0x1de   :  { %18 = sbr.rel (!%p16_p8) target bundleno = 3 (0x3), region = 98 }
 0x1e3   :  { %777 = vsyncpa [#allocation4], 1 }
 0x1e4   :  { %779 = vsyncpa [#allocation4 + $0x1], 1 }
 0x1e5   :  { %780 = vsyncpa [#allocation6], 1 }

</bundles_post_ra>
